<compile_context>
chip_gen: v7x
topology: tpu7x:2x2x1
jax: 0.10.0
libtpu: 0.0.40
codegen_flags: <defaults>
</compile_context>

<pallas_src>
import functools

import jax
import jax.numpy as jnp
from jax.experimental import pallas as pl
from jax.experimental.pallas import tpu as pltpu


# ----------------------------- Pallas kernels -------------------------------- #
def _sca_mlp_kernel(scales_ref,   # SMEM (2,)           [b*a0, b*a1]
                    mlp_in_ref,   # VMEM (1, F, TL)     location+cond features, L on lanes
                    w1t_ref,      # VMEM (Hm, F)        w1^T
                    b1_ref,       # VMEM (Hm, 1)
                    w2dt_ref,     # VMEM (K, Hm)        w2[:, :K]^T
                    b2d_ref,      # VMEM (K, 1)
                    w2pt_ref,     # VMEM (CC, Hm)       w2[:, K:]^T   (CC = Cin*Cout)
                    b2p_ref,      # VMEM (CC, 1)
                    kd_ref,       # VMEM (K, 1)         kernel_D flattened (kh, kw) row-major
                    kp_ref,       # VMEM (CC, 1)        kernel_P flattened (Cin, Cout) row-major
                    adjd_ref,     # VMEM (1, K, TL)           out
                    adjp_ref):    # VMEM (1, Cin, Cout, TL)   out
    s0 = scales_ref[0]
    s1 = scales_ref[1]

    m = mlp_in_ref[0]                                                        # (F, TL)
    h = jnp.dot(w1t_ref[...], m, preferred_element_type=jnp.float32) + b1_ref[...]
    h = h * jax.nn.sigmoid(h)                                                # SiLU  (Hm, TL)

    ad = jnp.dot(w2dt_ref[...], h, preferred_element_type=jnp.float32) + b2d_ref[...]  # (K, TL)
    ap = jnp.dot(w2pt_ref[...], h, preferred_element_type=jnp.float32) + b2p_ref[...]  # (CC, TL)

    adjd_ref[0] = kd_ref[...] + s0 * ad                                      # (K, TL)

    cin = adjp_ref.shape[1]
    cout = adjp_ref.shape[2]
    tl = adjp_ref.shape[3]
    adjp_ref[0] = (kp_ref[...] + s1 * ap).reshape(cin, cout, tl)             # (Cin, Cout, TL)


def _sca_apply_kernel(x_ref,      # VMEM (1, Cin, K, TL)   unfolded patches (maybe bf16)
                      adjd_ref,   # VMEM (1, K, TL)
                      adjp_ref,   # VMEM (1, Cin, Cout, TL)
                      bias_ref,   # VMEM (Cout, 1)
                      out_ref):   # VMEM (1, Cout, TL)
    x = x_ref[0].astype(jnp.float32)                                         # (Cin, K, TL)
    ad = adjd_ref[0]                                                         # (K, TL)
    # Depthwise: reduce over K (sublane reduce -> XLU, VPU stays lane-dense).
    zs = jnp.sum(x * ad[None, :, :], axis=1, keepdims=True)                  # (Cin, 1, TL)
    # Pointwise: reduce over Cin.
    ap = adjp_ref[0]                                                         # (Cin, Cout, TL)
    out = jnp.sum(zs * ap, axis=0)                                           # (Cout, TL)
    out_ref[0] = out + bias_ref[...]                                         # lane-dense store


# ------------------------------- Glue (JAX) ---------------------------------- #
def _unfold_nchw(x, kernel_size, stride, padding):
    """Equivalent of torch.nn.Unfold for NCHW input; returns (B, C, K, L)."""
    kh, kw = kernel_size
    sh, sw = stride
    ph, pw = padding
    xp = jnp.pad(x, ((0, 0), (0, 0), (ph, ph), (pw, pw)))
    B, C, Hp, Wp = xp.shape
    out_h = (Hp - kh) // sh + 1
    out_w = (Wp - kw) // sw + 1
    cols = []
    for i in range(kh):
        for j in range(kw):
            cols.append(xp[:, :, i:i + sh * out_h:sh, j:j + sw * out_w:sw])
    patches = jnp.stack(cols, axis=2)                          # (B, C, K, out_h, out_w)
    return patches.reshape(B, C, kh * kw, out_h * out_w), out_h, out_w


def _location_embed(out_h, out_w):
    """Exactly mirrors the PyTorch code (meshgrid 'ij' over (out_w, out_h))."""
    xc = jnp.linspace(0.0, 1.0, out_w)
    yc = jnp.linspace(0.0, 1.0, out_h)
    xn, yn = jnp.meshgrid(xc, yc, indexing="ij")               # (out_w, out_h)
    xn = xn.reshape(-1)
    yn = yn.reshape(-1)
    return jnp.stack([xn, 1.0 - xn, yn, 1.0 - yn], axis=-1)    # (L, 4)


def _choose_l_tile(L, max_tl=2048):
    """Largest lane-dense L tile: full L if it fits, else a multiple of 128."""
    if L <= max_tl:
        return L
    return max(128, max_tl - (max_tl % 128))


# ------------------------------- Forward pass -------------------------------- #
@functools.partial(jax.jit, static_argnames=("kernel_size", "stride", "padding",
                                             "condition", "x_unf_dtype", "max_l_tile"))
def scaconv_ds_forward(x, params, *, kernel_size, stride, padding,
                       b=1.0, condition=False, c=None,
                       x_unf_dtype=None, max_l_tile=2048):
    B, Cin, H, W = x.shape
    Cout = params["kernel_P"].shape[1]
    kh, kw = kernel_size
    K = kh * kw
    CC = Cin * Cout

    # TODO(synk): for very large Cin*H*W, move the im2col inside the apply kernel
    # (DMA padded rows + pltpu.roll shifted views) to avoid the K-fold HBM blow-up.
    x_unf, out_h, out_w = _unfold_nchw(x, kernel_size, stride, padding)      # (B,Cin,K,L)
    L = out_h * out_w
    if x_unf_dtype is not None:
        x_unf = x_unf.astype(x_unf_dtype)    # e.g. bf16: halves DMA bytes (v6e/v7x)

    # MLP input with L on lanes: (Badj, F, L).  Badj=1 when condition=False, so the
    # MLP runs once and its result is broadcast across the batch by the index_map.
    loc_t = _location_embed(out_h, out_w).T                                  # (4, L)
    if condition:
        c_arr = c.astype(jnp.float32)                                        # (B, c_len)
    else:
        c_arr = params["c"].astype(jnp.float32)                              # (1, c_len)
    Badj, c_len = c_arr.shape
    F = 4 + c_len
    mlp_in_t = jnp.concatenate(
        [jnp.broadcast_to(loc_t[None], (Badj, 4, L)),
         jnp.broadcast_to(c_arr[:, :, None], (Badj, c_len, L))],
        axis=1).astype(jnp.float32)                                          # (Badj, F, L)

    # Small parameters as transposed weights / column vectors (feature dim on sublanes).
    w1t = params["w1"].T                           # (Hm, F)
    b1c = params["b1"][:, None]                    # (Hm, 1)
    w2dt = params["w2"][:, :K].T                   # (K, Hm)   split second layer:
    w2pt = params["w2"][:, K:].T                   # (CC, Hm)  no unaligned slicing in-kernel
    b2dc = params["b2"][:K][:, None]               # (K, 1)
    b2pc = params["b2"][K:][:, None]               # (CC, 1)
    kdc = params["kernel_D"].reshape(K, 1)         # (K, 1)  row-major (kh, kw)
    kpc = params["kernel_P"].reshape(CC, 1)        # (CC, 1) row-major (Cin, Cout)
    biasc = params["bias"][:, None]                # (Cout, 1)
    scales = jnp.asarray([b * params["a"][0], b * params["a"][1]], jnp.float32)
    Hm = w1t.shape[0]

    TL = _choose_l_tile(L, max_l_tile)
    nL = pl.cdiv(L, TL)

    # ---- Kernel 1: fused MLP -> adjusted depthwise / pointwise kernels ----
    adjd, adjp = pl.pallas_call(
        _sca_mlp_kernel,
        out_shape=(jax.ShapeDtypeStruct((Badj, K, L), jnp.float32),
                   jax.ShapeDtypeStruct((Badj, Cin, Cout, L), jnp.float32)),
        grid=(Badj, nL),
        in_specs=[
            pl.BlockSpec(memory_space=pltpu.MemorySpace.SMEM),               # scales
            pl.BlockSpec((1, F, TL), lambda bi, li: (bi, 0, li)),            # mlp_in_t
            pl.BlockSpec((Hm, F), lambda bi, li: (0, 0)),                    # w1^T
            pl.BlockSpec((Hm, 1), lambda bi, li: (0, 0)),                    # b1
            pl.BlockSpec((K, Hm), lambda bi, li: (0, 0)),                    # w2_d^T
            pl.BlockSpec((K, 1), lambda bi, li: (0, 0)),                     # b2_d
            pl.BlockSpec((CC, Hm), lambda bi, li: (0, 0)),                   # w2_p^T
            pl.BlockSpec((CC, 1), lambda bi, li: (0, 0)),                    # b2_p
            pl.BlockSpec((K, 1), lambda bi, li: (0, 0)),                     # kernel_D
            pl.BlockSpec((CC, 1), lambda bi, li: (0, 0)),                    # kernel_P
        ],
        out_specs=(pl.BlockSpec((1, K, TL), lambda bi, li: (bi, 0, li)),
                   pl.BlockSpec((1, Cin, Cout, TL), lambda bi, li: (bi, 0, 0, li))),
        compiler_params=pltpu.CompilerParams(
            dimension_semantics=("parallel", "parallel")),
    )(scales, mlp_in_t, w1t, b1c, w2dt, b2dc, w2pt, b2pc, kdc, kpc)

    # Broadcast the single (condition=False) adjustment across the batch via index_map.
    if condition:
        adjd_map = lambda bi, li: (bi, 0, li)
        adjp_map = lambda bi, li: (bi, 0, 0, li)
    else:
        adjd_map = lambda bi, li: (0, 0, li)
        adjp_map = lambda bi, li: (0, 0, 0, li)

    # ---- Kernel 2: depthwise + pointwise reductions + bias, lane-dense output ----
    out = pl.pallas_call(
        _sca_apply_kernel,
        out_shape=jax.ShapeDtypeStruct((B, Cout, L), jnp.float32),
        grid=(B, nL),
        in_specs=[
            pl.BlockSpec((1, Cin, K, TL), lambda bi, li: (bi, 0, 0, li)),    # x_unf
            pl.BlockSpec((1, K, TL), adjd_map),                              # adjd
            pl.BlockSpec((1, Cin, Cout, TL), adjp_map),                      # adjp
            pl.BlockSpec((Cout, 1), lambda bi, li: (0, 0)),                  # bias
        ],
        out_specs=pl.BlockSpec((1, Cout, TL), lambda bi, li: (bi, 0, li)),
        compiler_params=pltpu.CompilerParams(
            dimension_semantics=("parallel", "parallel")),
    )(x_unf, adjd, adjp, biasc)

    # (B, Cout, L) reshapes directly to NCHW — no transpose needed.
    return out.reshape(B, Cout, out_h, out_w)


# ---------------------- Pure-JAX reference (for checking) --------------------- #
def reference_forward(x, params, *, kernel_size, stride, padding,
                      b=1.0, condition=False, c=None):
    B, Cin, H, W = x.shape
    Cout = params["kernel_P"].shape[1]
    kh, kw = kernel_size
    K = kh * kw
    x_unf, out_h, out_w = _unfold_nchw(x, kernel_size, stride, padding)      # (B,Cin,K,L)
    L = out_h * out_w
    loc = jnp.broadcast_to(_location_embed(out_h, out_w)[None], (B, L, 4))
    if condition:
        c_b = jnp.broadcast_to(c[:, None, :], (B, L, c.shape[-1]))
    else:
        c_b = jnp.broadcast_to(params["c"][None], (B, L, params["c"].shape[-1]))
    mlp_in = jnp.concatenate([loc, c_b], axis=-1).astype(jnp.float32)        # (B, L, F)
    h = mlp_in @ params["w1"] + params["b1"]
    h = h * jax.nn.sigmoid(h)
    adj = h @ params["w2"] + params["b2"]                                    # (B,L,K+Cin*Cout)
    a0 = b * params["a"][0]
    a1 = b * params["a"][1]
    adjusted_d = params["kernel_D"].reshape(1, 1, K) + a0 * adj[:, :, :K]    # (B, L, K)
    x_unf_t = jnp.transpose(x_unf, (0, 3, 1, 2))                             # (B, L, Cin, K)
    z_sum = jnp.sum(x_unf_t * adjusted_d[:, :, None, :], axis=-1)            # (B, L, Cin)
    adjusted_p = params["kernel_P"][None, None] + a1 * adj[:, :, K:].reshape(B, L, Cin, Cout)
    out = jnp.einsum("blc,blcd->bld", z_sum, adjusted_p) + params["bias"][None, None, :]
    z = jnp.transpose(out, (0, 2, 1))
    return z.reshape(B, Cout, out_h, out_w)


# ----------------------------- Parameter init --------------------------------- #
def init_params(key, in_channels, out_channels, kernel_size, mlp_hidden=16, c_len=8):
    kh, kw = kernel_size
    K = kh * kw
    F = 4 + c_len
    Dout = K + in_channels * out_channels
    keys = jax.random.split(key, 8)

    def xavier(k, shape):
        fan_out, fan_in = shape[0], shape[1]
        bound = (6.0 / (fan_in + fan_out)) ** 0.5
        return jax.random.uniform(k, shape, jnp.float32, -bound, bound)

    return dict(
        a=jnp.array([1.0, 1.0], jnp.float32),
        kernel_D=xavier(keys[0], (kh, kw)),
        kernel_P=xavier(keys[1], (in_channels, out_channels)),
        bias=jax.random.normal(keys[2], (out_channels,), jnp.float32),
        c=jax.random.normal(keys[3], (1, c_len), jnp.float32),
        w1=jax.random.normal(keys[4], (F, mlp_hidden), jnp.float32) * 0.3,
        b1=jax.random.normal(keys[5], (mlp_hidden,), jnp.float32) * 0.1,
        w2=jax.random.normal(keys[6], (mlp_hidden, Dout), jnp.float32) * 0.3,
        b2=jax.random.normal(keys[7], (Dout,), jnp.float32) * 0.1,
    )


if __name__ == "__main__":
    key = jax.random.PRNGKey(0)
    kx, kparams = jax.random.split(key)

    B, Cin, H, W = 2, 4, 16, 16
    Cout = 8
    ksize, stride, pad = (3, 3), (1, 1), (1, 1)

    params = init_params(kparams, Cin, Cout, ksize)
    x = jax.random.normal(kx, (B, Cin, H, W), jnp.float32)

    y = scaconv_ds_forward(x, params, kernel_size=ksize, stride=stride, padding=pad)
    y = jax.block_until_ready(y)

    y_ref = reference_forward(x, params, kernel_size=ksize, stride=stride, padding=pad)
    assert y.shape == (B, Cout, 16, 16), y.shape
    assert jnp.allclose(y, y_ref, atol=1e-4, rtol=1e-4), float(jnp.max(jnp.abs(y - y_ref)))

    # bf16 DMA path (v6e/v7x optimization): x_unf streamed as bfloat16, compute in f32.
    y_bf16 = scaconv_ds_forward(x, params, kernel_size=ksize, stride=stride, padding=pad,
                                x_unf_dtype=jnp.bfloat16)
    y_bf16 = jax.block_until_ready(y_bf16)
    assert jnp.allclose(y_bf16, y_ref, atol=1e-1, rtol=1e-1), \
        float(jnp.max(jnp.abs(y_bf16 - y_ref)))

    print("KERNEL_OK")
</pallas_src>

<mosaic_0001>
module attributes {stable_mosaic.version = 11 : i64} {
  func.func @_sca_mlp_kernel(%arg0: i32, %arg1: i32, %arg2: memref<2xf32, #tpu.memory_space<smem>>, %arg3: memref<1x12x256xf32, #tpu.memory_space<vmem>>, %arg4: memref<16x12xf32, #tpu.memory_space<vmem>>, %arg5: memref<16x1xf32, #tpu.memory_space<vmem>>, %arg6: memref<9x16xf32, #tpu.memory_space<vmem>>, %arg7: memref<9x1xf32, #tpu.memory_space<vmem>>, %arg8: memref<32x16xf32, #tpu.memory_space<vmem>>, %arg9: memref<32x1xf32, #tpu.memory_space<vmem>>, %arg10: memref<9x1xf32, #tpu.memory_space<vmem>>, %arg11: memref<32x1xf32, #tpu.memory_space<vmem>>, %arg12: memref<1x9x256xf32, #tpu.memory_space<vmem>>, %arg13: memref<1x4x8x256xf32, #tpu.memory_space<vmem>>) attributes {dimension_semantics = [#tpu.dimension_semantics<parallel>, #tpu.dimension_semantics<parallel>], iteration_bounds = array<i64: 1, 1>, scalar_prefetch = 0 : i64, scratch_operands = 0 : i64, tpu.core_type = #tpu.core_type<tc>, window_params = [{transform_indices = @transform_0, window_bounds = array<i64: 2>}, {transform_indices = @transform_1, window_bounds = array<i64: 1, 12, 256>}, {pipeline_mode = #tpu.pipeline_mode<synchronous>, transform_indices = @transform_2, window_bounds = array<i64: 16, 12>}, {pipeline_mode = #tpu.pipeline_mode<synchronous>, transform_indices = @transform_3, window_bounds = array<i64: 16, 1>}, {pipeline_mode = #tpu.pipeline_mode<synchronous>, transform_indices = @transform_4, window_bounds = array<i64: 9, 16>}, {pipeline_mode = #tpu.pipeline_mode<synchronous>, transform_indices = @transform_5, window_bounds = array<i64: 9, 1>}, {pipeline_mode = #tpu.pipeline_mode<synchronous>, transform_indices = @transform_6, window_bounds = array<i64: 32, 16>}, {pipeline_mode = #tpu.pipeline_mode<synchronous>, transform_indices = @transform_7, window_bounds = array<i64: 32, 1>}, {pipeline_mode = #tpu.pipeline_mode<synchronous>, transform_indices = @transform_8, window_bounds = array<i64: 9, 1>}, {pipeline_mode = #tpu.pipeline_mode<synchronous>, transform_indices = @transform_9, window_bounds = array<i64: 32, 1>}, {transform_indices = @transform_10, window_bounds = array<i64: 1, 9, 256>}, {transform_indices = @transform_11, window_bounds = array<i64: 1, 4, 8, 256>}]} {
    %c0 = arith.constant 0 : index
    %0 = memref.load %arg2[%c0] : memref<2xf32, #tpu.memory_space<smem>>
    %c1 = arith.constant 1 : index
    %1 = memref.load %arg2[%c1] : memref<2xf32, #tpu.memory_space<smem>>
    %c0_0 = arith.constant 0 : index
    %c0_1 = arith.constant 0 : index
    %c0_2 = arith.constant 0 : index
    %2 = vector.load %arg3[%c0_0, %c0_1, %c0_2] : memref<1x12x256xf32, #tpu.memory_space<vmem>>, vector<1x12x256xf32>
    %3 = vector.shape_cast %2 : vector<1x12x256xf32> to vector<12x256xf32>
    %c0_3 = arith.constant 0 : index
    %c0_4 = arith.constant 0 : index
    %4 = vector.load %arg4[%c0_3, %c0_4] : memref<16x12xf32, #tpu.memory_space<vmem>>, vector<16x12xf32>
    %cst = arith.constant dense<0.000000e+00> : vector<16x256xf32>
    %5 = tpu.matmul %4, %3, %cst {dimension_numbers = #tpu.dot_dimension_numbers<[1], [0], [0], [1], [0, 0, 1, 1], [], []>} : vector<16x12xf32>, vector<12x256xf32>, vector<16x256xf32> -> vector<16x256xf32>
    %c0_5 = arith.constant 0 : index
    %c0_6 = arith.constant 0 : index
    %6 = vector.load %arg5[%c0_5, %c0_6] : memref<16x1xf32, #tpu.memory_space<vmem>>, vector<16x1xf32>
    %7 = vector.broadcast %6 : vector<16x1xf32> to vector<16x256xf32>
    %8 = arith.addf %5, %7 : vector<16x256xf32>
    %9 = arith.negf %8 : vector<16x256xf32>
    %10 = math.exp %9 : vector<16x256xf32>
    %cst_7 = arith.constant 1.000000e+00 : f32
    %11 = vector.broadcast %cst_7 : f32 to vector<16x256xf32>
    %12 = arith.addf %11, %10 : vector<16x256xf32>
    %13 = arith.divf %11, %12 : vector<16x256xf32>
    %14 = arith.mulf %8, %13 : vector<16x256xf32>
    %c0_8 = arith.constant 0 : index
    %c0_9 = arith.constant 0 : index
    %15 = vector.load %arg6[%c0_8, %c0_9] : memref<9x16xf32, #tpu.memory_space<vmem>>, vector<9x16xf32>
    %cst_10 = arith.constant dense<0.000000e+00> : vector<9x256xf32>
    %16 = tpu.matmul %15, %14, %cst_10 {dimension_numbers = #tpu.dot_dimension_numbers<[1], [0], [0], [1], [0, 0, 1, 1], [], []>} : vector<9x16xf32>, vector<16x256xf32>, vector<9x256xf32> -> vector<9x256xf32>
    %c0_11 = arith.constant 0 : index
    %c0_12 = arith.constant 0 : index
    %17 = vector.load %arg7[%c0_11, %c0_12] : memref<9x1xf32, #tpu.memory_space<vmem>>, vector<9x1xf32>
    %18 = vector.broadcast %17 : vector<9x1xf32> to vector<9x256xf32>
    %19 = arith.addf %16, %18 : vector<9x256xf32>
    %c0_13 = arith.constant 0 : index
    %c0_14 = arith.constant 0 : index
    %20 = vector.load %arg8[%c0_13, %c0_14] : memref<32x16xf32, #tpu.memory_space<vmem>>, vector<32x16xf32>
    %cst_15 = arith.constant dense<0.000000e+00> : vector<32x256xf32>
    %21 = tpu.matmul %20, %14, %cst_15 {dimension_numbers = #tpu.dot_dimension_numbers<[1], [0], [0], [1], [0, 0, 1, 1], [], []>} : vector<32x16xf32>, vector<16x256xf32>, vector<32x256xf32> -> vector<32x256xf32>
    %c0_16 = arith.constant 0 : index
    %c0_17 = arith.constant 0 : index
    %22 = vector.load %arg9[%c0_16, %c0_17] : memref<32x1xf32, #tpu.memory_space<vmem>>, vector<32x1xf32>
    %23 = vector.broadcast %22 : vector<32x1xf32> to vector<32x256xf32>
    %24 = arith.addf %21, %23 : vector<32x256xf32>
    %c0_18 = arith.constant 0 : index
    %c0_19 = arith.constant 0 : index
    %25 = vector.load %arg10[%c0_18, %c0_19] : memref<9x1xf32, #tpu.memory_space<vmem>>, vector<9x1xf32>
    %26 = vector.broadcast %0 : f32 to vector<9x256xf32>
    %27 = arith.mulf %26, %19 : vector<9x256xf32>
    %28 = vector.broadcast %25 : vector<9x1xf32> to vector<9x256xf32>
    %29 = arith.addf %28, %27 : vector<9x256xf32>
    %c0_20 = arith.constant 0 : index
    %c0_21 = arith.constant 0 : index
    %c0_22 = arith.constant 0 : index
    %30 = vector.load %arg12[%c0_20, %c0_21, %c0_22] : memref<1x9x256xf32, #tpu.memory_space<vmem>>, vector<1x9x256xf32>
    %31 = vector.shape_cast %30 : vector<1x9x256xf32> to vector<9x256xf32>
    %32 = vector.shape_cast %29 : vector<9x256xf32> to vector<1x9x256xf32>
    tpu.vector_store %arg12[%c0_20, %c0_21, %c0_22], %32 {strides = array<i32>} : memref<1x9x256xf32, #tpu.memory_space<vmem>>, vector<1x9x256xf32>,
    %c0_23 = arith.constant 0 : index
    %c0_24 = arith.constant 0 : index
    %33 = vector.load %arg11[%c0_23, %c0_24] : memref<32x1xf32, #tpu.memory_space<vmem>>, vector<32x1xf32>
    %34 = vector.broadcast %1 : f32 to vector<32x256xf32>
    %35 = arith.mulf %34, %24 : vector<32x256xf32>
    %36 = vector.broadcast %33 : vector<32x1xf32> to vector<32x256xf32>
    %37 = arith.addf %36, %35 : vector<32x256xf32>
    %38 = vector.shape_cast %37 : vector<32x256xf32> to vector<4x8x256xf32>
    %c0_25 = arith.constant 0 : index
    %c0_26 = arith.constant 0 : index
    %c0_27 = arith.constant 0 : index
    %c0_28 = arith.constant 0 : index
    %39 = vector.load %arg13[%c0_25, %c0_26, %c0_27, %c0_28] : memref<1x4x8x256xf32, #tpu.memory_space<vmem>>, vector<1x4x8x256xf32>
    %40 = vector.shape_cast %39 : vector<1x4x8x256xf32> to vector<4x8x256xf32>
    %41 = vector.shape_cast %38 : vector<4x8x256xf32> to vector<1x4x8x256xf32>
    tpu.vector_store %arg13[%c0_25, %c0_26, %c0_27, %c0_28], %41 {strides = array<i32>} : memref<1x4x8x256xf32, #tpu.memory_space<vmem>>, vector<1x4x8x256xf32>,
    return
  }
  func.func @transform_0(%arg0: i32, %arg1: i32) -> i32 {
    %c0_i32 = arith.constant 0 : i32
    %c0_i32_0 = arith.constant 0 : i32
    return %c0_i32 : i32
  }
  func.func @transform_1(%arg0: i32, %arg1: i32) -> (i32, i32, i32) {
    %c0_i32 = arith.constant 0 : i32
    %c0_i32_0 = arith.constant 0 : i32
    return %arg0, %c0_i32, %arg1 : i32, i32, i32
  }
  func.func @transform_2(%arg0: i32, %arg1: i32) -> (i32, i32) {
    %c0_i32 = arith.constant 0 : i32
    %c0_i32_0 = arith.constant 0 : i32
    %c0_i32_1 = arith.constant 0 : i32
    return %c0_i32, %c0_i32_0 : i32, i32
  }
  func.func @transform_3(%arg0: i32, %arg1: i32) -> (i32, i32) {
    %c0_i32 = arith.constant 0 : i32
    %c0_i32_0 = arith.constant 0 : i32
    %c0_i32_1 = arith.constant 0 : i32
    return %c0_i32, %c0_i32_0 : i32, i32
  }
  func.func @transform_4(%arg0: i32, %arg1: i32) -> (i32, i32) {
    %c0_i32 = arith.constant 0 : i32
    %c0_i32_0 = arith.constant 0 : i32
    %c0_i32_1 = arith.constant 0 : i32
    return %c0_i32, %c0_i32_0 : i32, i32
  }
  func.func @transform_5(%arg0: i32, %arg1: i32) -> (i32, i32) {
    %c0_i32 = arith.constant 0 : i32
    %c0_i32_0 = arith.constant 0 : i32
    %c0_i32_1 = arith.constant 0 : i32
    return %c0_i32, %c0_i32_0 : i32, i32
  }
  func.func @transform_6(%arg0: i32, %arg1: i32) -> (i32, i32) {
    %c0_i32 = arith.constant 0 : i32
    %c0_i32_0 = arith.constant 0 : i32
    %c0_i32_1 = arith.constant 0 : i32
    return %c0_i32, %c0_i32_0 : i32, i32
  }
  func.func @transform_7(%arg0: i32, %arg1: i32) -> (i32, i32) {
    %c0_i32 = arith.constant 0 : i32
    %c0_i32_0 = arith.constant 0 : i32
    %c0_i32_1 = arith.constant 0 : i32
    return %c0_i32, %c0_i32_0 : i32, i32
  }
  func.func @transform_8(%arg0: i32, %arg1: i32) -> (i32, i32) {
    %c0_i32 = arith.constant 0 : i32
    %c0_i32_0 = arith.constant 0 : i32
    %c0_i32_1 = arith.constant 0 : i32
    return %c0_i32, %c0_i32_0 : i32, i32
  }
  func.func @transform_9(%arg0: i32, %arg1: i32) -> (i32, i32) {
    %c0_i32 = arith.constant 0 : i32
    %c0_i32_0 = arith.constant 0 : i32
    %c0_i32_1 = arith.constant 0 : i32
    return %c0_i32, %c0_i32_0 : i32, i32
  }
  func.func @transform_10(%arg0: i32, %arg1: i32) -> (i32, i32, i32) {
    %c0_i32 = arith.constant 0 : i32
    %c0_i32_0 = arith.constant 0 : i32
    return %arg0, %c0_i32, %arg1 : i32, i32, i32
  }
  func.func @transform_11(%arg0: i32, %arg1: i32) -> (i32, i32, i32, i32) {
    %c0_i32 = arith.constant 0 : i32
    %c0_i32_0 = arith.constant 0 : i32
    %c0_i32_1 = arith.constant 0 : i32
    return %arg0, %c0_i32, %c0_i32_0, %arg1 : i32, i32, i32, i32
  }
}

module attributes {stable_mosaic.version = 11 : i64} {
  func.func @_sca_apply_kernel(%arg0: i32, %arg1: i32, %arg2: memref<1x4x9x256xf32, #tpu.memory_space<vmem>>, %arg3: memref<1x9x256xf32, #tpu.memory_space<vmem>>, %arg4: memref<1x4x8x256xf32, #tpu.memory_space<vmem>>, %arg5: memref<8x1xf32, #tpu.memory_space<vmem>>, %arg6: memref<1x8x256xf32, #tpu.memory_space<vmem>>) attributes {dimension_semantics = [#tpu.dimension_semantics<parallel>, #tpu.dimension_semantics<parallel>], iteration_bounds = array<i64: 2, 1>, scalar_prefetch = 0 : i64, scratch_operands = 0 : i64, tpu.core_type = #tpu.core_type<tc>, window_params = [{transform_indices = @transform_0, window_bounds = array<i64: 1, 4, 9, 256>}, {transform_indices = @transform_1, window_bounds = array<i64: 1, 9, 256>}, {transform_indices = @transform_2, window_bounds = array<i64: 1, 4, 8, 256>}, {pipeline_mode = #tpu.pipeline_mode<synchronous>, transform_indices = @transform_3, window_bounds = array<i64: 8, 1>}, {transform_indices = @transform_4, window_bounds = array<i64: 1, 8, 256>}]} {
    %c0 = arith.constant 0 : index
    %c0_0 = arith.constant 0 : index
    %c0_1 = arith.constant 0 : index
    %c0_2 = arith.constant 0 : index
    %0 = vector.load %arg2[%c0, %c0_0, %c0_1, %c0_2] : memref<1x4x9x256xf32, #tpu.memory_space<vmem>>, vector<1x4x9x256xf32>
    %1 = vector.shape_cast %0 : vector<1x4x9x256xf32> to vector<4x9x256xf32>
    %c0_3 = arith.constant 0 : index
    %c0_4 = arith.constant 0 : index
    %c0_5 = arith.constant 0 : index
    %2 = vector.load %arg3[%c0_3, %c0_4, %c0_5] : memref<1x9x256xf32, #tpu.memory_space<vmem>>, vector<1x9x256xf32>
    %3 = vector.shape_cast %2 : vector<1x9x256xf32> to vector<9x256xf32>
    %4 = vector.shape_cast %3 : vector<9x256xf32> to vector<1x9x256xf32>
    %5 = vector.broadcast %4 : vector<1x9x256xf32> to vector<4x9x256xf32>
    %6 = arith.mulf %1, %5 : vector<4x9x256xf32>
    %cst = arith.constant dense<0.000000e+00> : vector<4x256xf32>
    %7 = vector.multi_reduction <add>, %6, %cst [1] : vector<4x9x256xf32> to vector<4x256xf32>
    %8 = vector.shape_cast %7 : vector<4x256xf32> to vector<4x1x256xf32>
    %c0_6 = arith.constant 0 : index
    %c0_7 = arith.constant 0 : index
    %c0_8 = arith.constant 0 : index
    %c0_9 = arith.constant 0 : index
    %9 = vector.load %arg4[%c0_6, %c0_7, %c0_8, %c0_9] : memref<1x4x8x256xf32, #tpu.memory_space<vmem>>, vector<1x4x8x256xf32>
    %10 = vector.shape_cast %9 : vector<1x4x8x256xf32> to vector<4x8x256xf32>
    %11 = vector.broadcast %8 : vector<4x1x256xf32> to vector<4x8x256xf32>
    %12 = arith.mulf %11, %10 : vector<4x8x256xf32>
    %cst_10 = arith.constant dense<0.000000e+00> : vector<8x256xf32>
    %13 = vector.multi_reduction <add>, %12, %cst_10 [0] : vector<4x8x256xf32> to vector<8x256xf32>
    %c0_11 = arith.constant 0 : index
    %c0_12 = arith.constant 0 : index
    %14 = vector.load %arg5[%c0_11, %c0_12] : memref<8x1xf32, #tpu.memory_space<vmem>>, vector<8x1xf32>
    %15 = vector.broadcast %14 : vector<8x1xf32> to vector<8x256xf32>
    %16 = arith.addf %13, %15 : vector<8x256xf32>
    %c0_13 = arith.constant 0 : index
    %c0_14 = arith.constant 0 : index
    %c0_15 = arith.constant 0 : index
    %17 = vector.load %arg6[%c0_13, %c0_14, %c0_15] : memref<1x8x256xf32, #tpu.memory_space<vmem>>, vector<1x8x256xf32>
    %18 = vector.shape_cast %17 : vector<1x8x256xf32> to vector<8x256xf32>
    %19 = vector.shape_cast %16 : vector<8x256xf32> to vector<1x8x256xf32>
    tpu.vector_store %arg6[%c0_13, %c0_14, %c0_15], %19 {strides = array<i32>} : memref<1x8x256xf32, #tpu.memory_space<vmem>>, vector<1x8x256xf32>,
    return
  }
  func.func @transform_0(%arg0: i32, %arg1: i32) -> (i32, i32, i32, i32) {
    %c0_i32 = arith.constant 0 : i32
    %c0_i32_0 = arith.constant 0 : i32
    %c0_i32_1 = arith.constant 0 : i32
    return %arg0, %c0_i32, %c0_i32_0, %arg1 : i32, i32, i32, i32
  }
  func.func @transform_1(%arg0: i32, %arg1: i32) -> (i32, i32, i32) {
    %c0_i32 = arith.constant 0 : i32
    %c0_i32_0 = arith.constant 0 : i32
    %c0_i32_1 = arith.constant 0 : i32
    return %c0_i32, %c0_i32_0, %arg1 : i32, i32, i32
  }
  func.func @transform_2(%arg0: i32, %arg1: i32) -> (i32, i32, i32, i32) {
    %c0_i32 = arith.constant 0 : i32
    %c0_i32_0 = arith.constant 0 : i32
    %c0_i32_1 = arith.constant 0 : i32
    %c0_i32_2 = arith.constant 0 : i32
    return %c0_i32, %c0_i32_0, %c0_i32_1, %arg1 : i32, i32, i32, i32
  }
  func.func @transform_3(%arg0: i32, %arg1: i32) -> (i32, i32) {
    %c0_i32 = arith.constant 0 : i32
    %c0_i32_0 = arith.constant 0 : i32
    %c0_i32_1 = arith.constant 0 : i32
    return %c0_i32, %c0_i32_0 : i32, i32
  }
  func.func @transform_4(%arg0: i32, %arg1: i32) -> (i32, i32, i32) {
    %c0_i32 = arith.constant 0 : i32
    %c0_i32_0 = arith.constant 0 : i32
    return %arg0, %c0_i32, %arg1 : i32, i32, i32
  }
}

</mosaic_0001>

<bundles_post_ra>
// kernel: scaconv_ds_forward.3
= control target key start
LH: loop header
LB: loop body
LE: loop exit
PB: predicated region body
PF: predicated region fallthrough
CT: control target
= control target key end

     0   :  { %s622_s15 = smov 0   ;;  %s624_s16 = smov 0   ;;  %s724_s0 = inlined_call_operand.vmem [shape: f32[2,4,9,256], index: 0, kind: input, shape index: {}]   ;;  %s725_s1 = inlined_call_operand.vmem [shape: f32[1,9,256], index: 1, kind: input, shape index: {}]   ;;  %s726_s2 = inlined_call_operand.vmem [shape: f32[1,4,8,256], index: 2, kind: input, shape index: {}]   ;;  %s727_s3 = inlined_call_operand.vmem [shape: f32[8,1], index: 3, kind: input, shape index: {}]   ;;  %s728_s4 = inlined_call_operand.vmem [shape: f32[2,8,256], index: 4, kind: output, shape index: {}]  }
   0x1   :  { %s626_s17 = smov 0  }
   0x2 LB: > { %s26_s18 = sadd.s32 1, %s590_s16  ;;  %p537_p0 = scmp.ge.s32.totalorder %s594_s17, 1  ;;  %s594_s17 = sphi %s626_s17, %s14_s17   ;;  %s590_s16 = sphi %s624_s16, %s730_s16   ;;  %s586_s15 = sphi %s622_s15, %s729_s15  }
   0x3   : > { %p28_p1 = scmp.ge.s32.totalorder %s26_s18, 2  ;;  %p205_p2 = scmp.lt.s32.totalorder %s594_s17, 3 }
   0x5   : > { %s732_s18 = smov (%p28_p1, %s26_s18), 0  ;;  %p206_p3 = pnand %p537_p0, %p205_p2 }
   0x6   : > { %v404_v0 = vld [vmem:[%s727_s3] sm:$0xff] (!%p206_p3)  ;;  %v596_v1 = vmov (!%p206_p3), 0   ;;  %p250_p4 = scmp.lt.s32.totalorder (!%p206_p3), %s586_s15, 1  ;;  %v299_v2 = vld [vmem:[%s725_s1 + $0x10] sm:$0x1] (!%p206_p3)  ;;  %v298_v9 = vld [vmem:[%s725_s1 + $0x8] sm:$0xff] (!%p206_p3) }
   0x7   : > { %209 = sbr.rel (%p206_p3) target bundleno = 139 (0x8b), region = 36  ;;  %571 = vset.pattern.permute.xlu0 (!%p206_p3), %v596_v1  ;;  %v300_v5 = vld [vmem:[%s725_s1 + $0x18] sm:$0x1] (!%p206_p3)  ;;  %v297_v8 = vld [vmem:[%s725_s1] sm:$0xff] (!%p206_p3)  ;;  %vm317_vm0 = vcmask (!%p206_p3), 1040384  }
   0x8   : > { %407 = vperm.xlu0 (!%p206_p3), %571, %v404_v0  }
   0xe   : > { %s734_s15 = smov (!%p250_p4, %s586_s15), 1 }
   0xf   : > { %s544_s21 = sshll.u32 %s734_s15, 7  ;;  %s545_s27 = sshll.u32 %s734_s15, 4 }
  0x10   : > { %s649_s24 = scalar_lea.vmem %s724_s0, %s544_s21  ;;  %s279_s30 = scalar_lea.vmem %s728_s4, %s545_s27 }
  0x11   : > { %v283_v3 = vld [vmem:[%s649_s24 + $0x10] sm:$0x1]  ;;  %v284_v4 = vld [vmem:[%s649_s24 + $0x18] sm:$0x1]  ;;  %v281_v10 = vld [vmem:[%s649_s24] sm:$0xff] }
  0x12   : > { %v287_v6 = vld [vmem:[%s649_s24 + $0x30] sm:$0x1]  ;;  %v288_v7 = vld [vmem:[%s649_s24 + $0x38] sm:$0x1]  ;;  %v282_v11 = vld [vmem:[%s649_s24 + $0x8] sm:$0xff]  ;;  %v303_v13 = vmul.f32 %v299_v2, %v283_v3  ;;  %v304_v14 = vmul.f32 %v300_v5, %v284_v4  ;;  %v301_v20 = vmul.f32 %v297_v8, %v281_v10 }
  0x13   : > { %v285_v12 = vld [vmem:[%s649_s24 + $0x20] sm:$0xff]  ;;  %v286_v15 = vld [vmem:[%s649_s24 + $0x28] sm:$0xff]  ;;  %v291_v16 = vld [vmem:[%s649_s24 + $0x50] sm:$0x1]  ;;  %v307_v17 = vmul.f32 %v299_v2, %v287_v6  ;;  %v308_v18 = vmul.f32 %v300_v5, %v288_v7  ;;  %v302_v21 = vmul.f32 %v298_v9, %v282_v11 }
  0x14   : > { %v292_v19 = vld [vmem:[%s649_s24 + $0x58] sm:$0x1]  ;;  %v305_v22 = vmul.f32 %v297_v8, %v285_v12  ;;  %v289_v23 = vld [vmem:[%s649_s24 + $0x40] sm:$0xff]  ;;  %v290_v24 = vld [vmem:[%s649_s24 + $0x48] sm:$0xff]  ;;  %v306_v25 = vmul.f32 %v298_v9, %v286_v15  ;;  %v311_v26 = vmul.f32 %v299_v2, %v291_v16  ;;  %v318_v27 = vsel %vm317_vm0, %v303_v13, 0.0 }
  0x15   : > { %v326_v28 = vsel %vm317_vm0, %v304_v14, 0.0  ;;  %v295_v29 = vld [vmem:[%s649_s24 + $0x70] sm:$0x1]  ;;  %v312_v30 = vmul.f32 %v300_v5, %v292_v19  ;;  %v334_v31 = vsel %vm317_vm0, %v307_v17, 0.0  ;;  %v342_v32 = vsel %vm317_vm0, %v308_v18, 0.0  ;;  %v293_v34 = vld [vmem:[%s649_s24 + $0x60] sm:$0xff] }
  0x16   : > { %v296_v33 = vld [vmem:[%s649_s24 + $0x78] sm:$0x1]  ;;  %v309_v35 = vmul.f32 %v297_v8, %v289_v23  ;;  %v310_v36 = vmul.f32 %v298_v9, %v290_v24  ;;  %v319_v37 = vadd.f32 %v318_v27, %v301_v20  ;;  %v327_v38 = vadd.f32 %v326_v28, %v302_v21  ;;  %v294_v39 = vld [vmem:[%s649_s24 + $0x68] sm:$0xff] }
  0x17   : > { %v315_v40 = vmul.f32 %v299_v2, %v295_v29  ;;  %v335_v41 = vadd.f32 %v334_v31, %v305_v22  ;;  %v343_v42 = vadd.f32 %v342_v32, %v306_v25  ;;  %v350_v43 = vsel %vm317_vm0, %v311_v26, 0.0  ;;  %v382_v32 = vld [vmem:[%s726_s2] sm:$0xff] }
  0x18   : > { %v316_v44 = vmul.f32 %v300_v5, %v296_v33  ;;  %v358_v45 = vsel %vm317_vm0, %v312_v30, 0.0  ;;  %v313_v46 = vmul.f32 %v297_v8, %v293_v34  ;;  %v314_v47 = vmul.f32 %v298_v9, %v294_v39  ;;  %v383_v33 = vld [vmem:[%s726_s2 + $0x8] sm:$0xff]  ;;  %v384_v34 = vld [vmem:[%s726_s2 + $0x10] sm:$0xff] }
  0x19   : > { %v320_v48 = vrot.slane %v319_v37, 4  ;;  %v328_v49 = vrot.slane %v327_v38, 4  ;;  %v351_v50 = vadd.f32 %v350_v43, %v309_v35  ;;  %v336_v51 = vrot.slane %v335_v41, 4  ;;  %v385_v35 = vld [vmem:[%s726_s2 + $0x18] sm:$0xff] }
  0x1a   : > { %v344_v52 = vrot.slane %v343_v42, 4  ;;  %v359_v53 = vadd.f32 %v358_v45, %v310_v36  ;;  %v366_v54 = vsel %vm317_vm0, %v315_v40, 0.0  ;;  %v374_v55 = vsel %vm317_vm0, %v316_v44, 0.0  ;;  %v387_v45 = vld [vmem:[%s726_s2 + $0x28] sm:$0xff] }
  0x1b   : > { %v321_v56 = vadd.f32 %v320_v48, %v319_v37  ;;  %v329_v57 = vadd.f32 %v328_v49, %v327_v38  ;;  %v352_v58 = vrot.slane %v351_v50, 4  ;;  %v367_v59 = vadd.f32 %v366_v54, %v313_v46 }
  0x1c   : > { %v337_v60 = vadd.f32 %v336_v51, %v335_v41  ;;  %v345_v61 = vadd.f32 %v344_v52, %v343_v42  ;;  %v360_v62 = vrot.slane %v359_v53, 4  ;;  %v375_v63 = vadd.f32 %v374_v55, %v314_v47  ;;  %v386_v42 = vld [vmem:[%s726_s2 + $0x20] sm:$0xff]  ;;  %v388_v52 = vld [vmem:[%s726_s2 + $0x30] sm:$0xff] }
  0x1d   : > { %v322_v0 = vrot.slane %v321_v56, 2  ;;  %v330_v1 = vrot.slane %v329_v57, 2  ;;  %v353_v2 = vadd.f32 %v352_v58, %v351_v50  ;;  %v368_v3 = vrot.slane %v367_v59, 4 }
  0x1e   : > { %v338_v4 = vrot.slane %v337_v60, 2  ;;  %v346_v5 = vrot.slane %v345_v61, 2  ;;  %v361_v6 = vadd.f32 %v360_v62, %v359_v53  ;;  %v376_v7 = vrot.slane %v375_v63, 4  ;;  %v389_v53 = vld [vmem:[%s726_s2 + $0x38] sm:$0xff] }
  0x1f   : > { %v323_v8 = vadd.f32 %v322_v0, %v321_v56  ;;  %v331_v9 = vadd.f32 %v330_v1, %v329_v57  ;;  %v354_v10 = vrot.slane %v353_v2, 2  ;;  %v369_v11 = vadd.f32 %v368_v3, %v367_v59 }
  0x20   : > { %v339_v12 = vadd.f32 %v338_v4, %v337_v60  ;;  %v347_v13 = vadd.f32 %v346_v5, %v345_v61  ;;  %v362_v14 = vrot.slane %v361_v6, 2  ;;  %v377_v15 = vadd.f32 %v376_v7, %v375_v63 }
  0x21   : > { %v324_v16 = vrot.slane %v323_v8, 1  ;;  %v332_v17 = vrot.slane %v331_v9, 1  ;;  %v355_v18 = vadd.f32 %v354_v10, %v353_v2  ;;  %v370_v19 = vrot.slane %v369_v11, 2 }
  0x22   : > { %v340_v20 = vrot.slane %v339_v12, 1  ;;  %v348_v21 = vrot.slane %v347_v13, 1  ;;  %v363_v22 = vadd.f32 %v362_v14, %v361_v6  ;;  %v378_v23 = vrot.slane %v377_v15, 2 }
  0x23   : > { %v325_v24 = vadd.f32 %v324_v16, %v323_v8  ;;  %v333_v25 = vadd.f32 %v332_v17, %v331_v9  ;;  %v356_v26 = vrot.slane %v355_v18, 1  ;;  %v371_v27 = vadd.f32 %v370_v19, %v369_v11 }
  0x24   : > { %v341_v28 = vadd.f32 %v340_v20, %v339_v12  ;;  %v349_v29 = vadd.f32 %v348_v21, %v347_v13  ;;  %v364_v30 = vrot.slane %v363_v22, 1  ;;  %v379_v31 = vadd.f32 %v378_v23, %v377_v15 }
  0x25   : > { %v357_v36 = vadd.f32 %v356_v26, %v355_v18  ;;  %v372_v37 = vrot.slane %v371_v27, 1  ;;  %v390_v38 = vmul.f32 %v382_v32, %v325_v24  ;;  %v391_v39 = vmul.f32 %v383_v33, %v333_v25 }
  0x26   : > { %v365_v40 = vadd.f32 %v364_v30, %v363_v22  ;;  %v380_v41 = vrot.slane %v379_v31, 1  ;;  %v392_v43 = vmul.f32 %v384_v34, %v341_v28  ;;  %v393_v44 = vmul.f32 %v385_v35, %v349_v29 }
  0x27   : > { %v373_v46 = vadd.f32 %v372_v37, %v371_v27  ;;  %v394_v47 = vmul.f32 %v386_v42, %v357_v36 }
  0x28   : > { %v381_v48 = vadd.f32 %v380_v41, %v379_v31  ;;  %v395_v49 = vmul.f32 %v387_v45, %v365_v40  ;;  %v398_v50 = vadd.f32 %v392_v43, %v390_v38  ;;  %v401_v51 = vadd.f32 %v393_v44, %v391_v39 }
  0x29   : > { %v396_v54 = vmul.f32 %v388_v52, %v373_v46 }
  0x2a   : > { %v397_v55 = vmul.f32 %v389_v53, %v381_v48  ;;  %v399_v56 = vadd.f32 %v398_v50, %v394_v47  ;;  %v402_v57 = vadd.f32 %v401_v51, %v395_v49 }
  0x2c   : > { %v400_v58 = vadd.f32 %v399_v56, %v396_v54  ;;  %v403_v59 = vadd.f32 %v402_v57, %v397_v55 }
  0x87   : > { %v408_v60 = vpop.permute.xlu0 %407 }
  0x88   : > { %v410_v61 = vadd.f32 %v408_v60, %v400_v58  ;;  %v411_v62 = vadd.f32 %v408_v60, %v403_v59 }
  0x8a   : > { %412 = vst [vmem:[%s279_s30] sm:$0xff] %v410_v61  ;;  %413 = vst [vmem:[%s279_s30 + $0x8] sm:$0xff] %v411_v62 }
  0x8b PF: > { %s14_s17 = sadd.s32 1, %s594_s17   ;;  %s729_s15 = smov %s590_s16 }
  0x8c   : > { %p11_p5 = scmp.ge.s32.totalorder %s14_s17, 4   ;;  %s730_s16 = smov %s732_s18 }
  0x8e   :  { %13 = sbr.rel (!%p11_p5) target bundleno = 2 (0x2), region = 72 }

// kernel: scaconv_ds_forward.2
= control target key start
LH: loop header
LB: loop body
LE: loop exit
PB: predicated region body
PF: predicated region fallthrough
CT: control target
= control target key end

     0   :  { %17 = vsyncpa [#allocation3], 0  ;;  %s753_s0 = inlined_call_operand.vmem [shape: f32[2], index: 0, kind: input, shape index: {}]   ;;  %s754_s1 = inlined_call_operand.vmem [shape: f32[1,12,256], index: 1, kind: input, shape index: {}]   ;;  %s755_s2 = inlined_call_operand.vmem [shape: f32[16,12], index: 2, kind: input, shape index: {}]   ;;  %s756_s3 = inlined_call_operand.vmem [shape: f32[16,1], index: 3, kind: input, shape index: {}]   ;;  %s757_s4 = inlined_call_operand.vmem [shape: f32[9,16], index: 4, kind: input, shape index: {}]   ;;  %s758_s5 = inlined_call_operand.vmem [shape: f32[9,1], index: 5, kind: input, shape index: {}]   ;;  %s759_s6 = inlined_call_operand.vmem [shape: f32[32,16], index: 6, kind: input, shape index: {}]   ;;  %s760_s7 = inlined_call_operand.vmem [shape: f32[32,1], index: 7, kind: input, shape index: {}]   ;;  %s761_s8 = inlined_call_operand.vmem [shape: f32[9,1], index: 8, kind: input, shape index: {}]   ;;  %s762_s9 = inlined_call_operand.vmem [shape: f32[32,1], index: 9, kind: input, shape index: {}]   ;;  %s763_s10 = inlined_call_operand.vmem [shape: f32[1,9,256], index: 10, kind: output, shape index: {0}]   ;;  %s764_s11 = inlined_call_operand.vmem [shape: f32[1,4,8,256], index: 11, kind: output, shape index: {1}]  }
   0x1   :  { %s24_s19 = sshll.u32 %s753_s0, 4  ;;  %s25_s19 = int_to_ptr.vmem [resolvable:$true] %s24_s19 }
   0x2   :  { %s550_s20 = scalar_lea.vmem %s25_s19, 16  ;;  %p555_p1 = scmp.lt.s32.totalorder %s25_s19, %s25_s19 }
   0x3   :  { %p551_p0 = scmp.ne.s32.totalorder %s25_s19, %s550_s20  ;;  %p556_p2 = scmp.lt.s32.totalorder %s550_s20, %s550_s20 }
   0x5   :  { %p557_p3 = por %p556_p2, %p555_p1 }
   0x7   :  { %p558_p4 = pnand %p557_p3, %p551_p0 }
   0x9   :  { %561 = shalt.err (!%p558_p4)
}
   0xa   :  { %s564_s21 = smov [#allocation2]  }
   0xb   :  { %27 = dma.vmem_to_smem %s25_s19, 16, %s564_s21, [#allocation3]  }
   0xc   :  { %562 = dma.done.wait [#allocation3], 16  }
   0xd   :  { %563 = vsyncadd [#allocation3], 4294967280 }
   0xe   :  { %49 = sfence }
   0xf   :  { %v53_v0 = vld [vmem:[%s754_s1 + $0x8] sm:$0xff]  ;;  %v55_v1 = vld [vmem:[%s754_s1 + $0x18] sm:$0xf]  ;;  %vm77_vm0 = vcmask 1043456   ;;  %v52_v2 = vld [vmem:[%s754_s1] sm:$0xff]  ;;  %vm565_vm1 = vmmov 1  }
  0x10   :  { %v514_v3 = vpack.c.bf16 %v55_v1, %v53_v0  ;;  %vm515_vm2 = vmpackc.low %vm77_vm0, %vm565_vm1  ;;  %v54_v4 = vld [vmem:[%s754_s1 + $0x10] sm:$0xf]  ;;  %v566_v6 = vmov 0.0   ;;  %v567_v7 = vmov 0   ;;  %v58_v8 = vld [vmem:[%s756_s3] sm:$0xff]  ;;  %vm70_vm3 = vcmask 97280  }
  0x11   :  { %v517_v5 = vpack.c.bf16 %v54_v4, %v52_v2  ;;  %148 = vmatprep.mubr.f32.mxu1 %v566_v6  ;;  %532 = vset.pattern.permute.xlu0 %v567_v7  ;;  %v56_v9 = vld [vmem:[%s755_s2] sm:$0xff]  ;;  %v59_v10 = vld [vmem:[%s756_s3 + $0x8] sm:$0xff]  ;;  %v293_v13 = vld [vmem:[%s760_s7 + $0x10] sm:$0xff]  ;;  %vm203_vm4 = vcmask 130048   ;;  %s499_s24 = sld [smem:[#allocation2 + $0x1]] }
  0x12   :  { %516 = vmatprep.subr.msk.bf16.mxu1 %vm515_vm2, %v514_v3  ;;  %62 = vperm.xlu0 %532, %v58_v8   ;;  %v57_v11 = vld [vmem:[%s755_s2 + $0x8] sm:$0xff]  ;;  %v291_v12 = vld [vmem:[%s760_s7] sm:$0xff]  ;;  %v443_v16 = vld [vmem:[%s762_s9 + $0x10] sm:$0xff] }
  0x13   :  { %519 = vmatpush1.bf16.msk.msra.mxu1 %vm515_vm2, %v517_v5  ;;  %391 = vmatprep.mubr.f32.mxu0 %v566_v6  ;;  %v416_v14 = vld [vmem:[%s761_s8] sm:$0xff]  ;;  %v192_v18 = vld [vmem:[%s758_s5 + $0x8] sm:$0x1]  ;;  %v294_v20 = vld [vmem:[%s760_s7 + $0x18] sm:$0xff] }
  0x14   :  { %533 = vset.pattern.permute.xlu1 %v567_v7  ;;  %v441_v15 = vld [vmem:[%s762_s9] sm:$0xff]  ;;  %v292_v19 = vld [vmem:[%s760_s7 + $0x8] sm:$0xff]  ;;  %v444_v23 = vld [vmem:[%s762_s9 + $0x18] sm:$0xff] }
  0x15   :  { %v191_v17 = vld [vmem:[%s758_s5] sm:$0xff]  ;;  %v417_v21 = vld [vmem:[%s761_s8 + $0x8] sm:$0x1]  ;;  %v289_v60 = vld [vmem:[%s759_s6 + $0x10] sm:$0xff] }
  0x16   :  { %502 = vmatmul.mubr.msk.f32.vlgmr.msra.gmra.mrb[0].mxu1 %vm70_vm3, %v56_v9  ;;  %67 = vperm.xlu0 %532, %v59_v10   ;;  %v442_v22 = vld [vmem:[%s762_s9 + $0x8] sm:$0xff]  ;;  %v189_v56 = vld [vmem:[%s757_s4] sm:$0xff]  ;;  %v290_v61 = vld [vmem:[%s759_s6 + $0x18] sm:$0xff] }
  0x17   :  { %154 = vmatprep.mubr.f32.mxu1 %v566_v6  ;;  %195 = vperm.xlu1 %533, %v191_v17   ;;  %v287_v57 = vld [vmem:[%s759_s6] sm:$0xff]  ;;  %v190_v58 = vld [vmem:[%s757_s4 + $0x8] sm:$0x1]  ;;  %s50_s4 = sld [smem:[#allocation2]]  ;;  %v445_v9 = vstv %s499_s24 }
  0x18   :  { %v288_v59 = vld [vmem:[%s759_s6 + $0x8] sm:$0xff] }
  0x1a   :  { %503 = vmatmul.mubr.msk.f32.gmra.mrb[2].mxu1 %vm70_vm3, %v57_v11  ;;  %297 = vperm.xlu0 %532, %v291_v12  }
  0x1b   :  { %274 = vmatprep.mubr.f32.mxu1 %v566_v6  ;;  %200 = vperm.xlu1 %533, %v192_v18  }
  0x1d   :  { %v418_v7 = vstv %s50_s4 }
  0x1e   :  { %307 = vperm.xlu0 %532, %v293_v13  }
  0x1f   :  { %302 = vperm.xlu1 %533, %v292_v19  }
  0x22   :  { %425 = vperm.xlu0 %532, %v416_v14  }
  0x23   :  { %312 = vperm.xlu1 %533, %v294_v20  }
  0x26   :  { %456 = vperm.xlu0 %532, %v441_v15  }
  0x27   :  { %430 = vperm.xlu1 %533, %v417_v21  }
  0x2a   :  { %466 = vperm.xlu0 %532, %v443_v16  }
  0x2b   :  { %461 = vperm.xlu1 %533, %v442_v22  }
  0x2f   :  { %471 = vperm.xlu1 %533, %v444_v23  }
  0x91   :  { %v63_v24 = vpop.permute.xlu0 %62 }
  0x95   :  { %v68_v30 = vpop.permute.xlu0 %67 }
  0x96   :  { %v196_v62 = vpop.permute.xlu1 %195 }
  0x99   :  { %v298_v0 = vpop.permute.xlu0 %297 }
  0x9a   :  { %v201_v63 = vpop.permute.xlu1 %200 }
  0x9d   :  { %v308_v2 = vpop.permute.xlu0 %307 }
  0x9e   :  { %v303_v1 = vpop.permute.xlu1 %302 }
  0xa1   :  { %v426_v4 = vpop.permute.xlu0 %425 }
  0xa2   :  { %v313_v3 = vpop.permute.xlu1 %312 }
  0xa5   :  { %v457_v16 = vpop.permute.xlu0 %456 }
  0xa6   :  { %v431_v13 = vpop.permute.xlu1 %430 }
  0xe9   :  { %v150_v25 = vpop.f32.mrb[0].mxu1 }
  0xea   :  { %v151_v26 = vadd.f32 %v150_v25, %v63_v24  ;;  %v152_v27 = vpop.f32.mrb[1].mxu1 }
  0xeb   :  { %v153_v28 = vadd.f32 %v152_v27, %v63_v24 }
  0xec   :  { %v504_v29 = vmul.f32 -1.442695, %v151_v26 }
  0xed   :  { %v505_v31 = vmul.f32 -1.442695, %v153_v28  ;;  %v156_v32 = vpop.f32.mrb[2].mxu1 }
  0xee   :  { %534 = vpow2.f32 %v504_v29  ;;  %v157_v33 = vadd.f32 %v156_v32, %v68_v30  ;;  %v158_v34 = vpop.f32.mrb[3].mxu1 }
  0xef   :  { %536 = vpow2.f32 %v505_v31  ;;  %v159_v35 = vadd.f32 %v158_v34, %v68_v30 }
  0xf0   :  { %v506_v36 = vmul.f32 -1.442695, %v157_v33 }
  0xf1   :  { %v507_v37 = vmul.f32 -1.442695, %v159_v35 }
  0xf2   :  { %538 = vpow2.f32 %v506_v36 }
  0xf3   :  { %540 = vpow2.f32 %v507_v37 }
  0xf8   :  { %v535_v38 = vpop.eup %534 }
  0xf9   :  { %v537_v39 = vpop.eup %536  ;;  %v173_v40 = vadd.f32 1.0, %v535_v38 }
  0xfa   :  { %v174_v41 = vadd.f32 1.0, %v537_v39 }
  0xfb   :  { %542 = vrcp.f32 %v173_v40 }
  0xfc   :  { %v539_v42 = vpop.eup %538  ;;  %544 = vrcp.f32 %v174_v41 }
  0xfd   :  { %v541_v43 = vpop.eup %540  ;;  %v175_v44 = vadd.f32 1.0, %v539_v42 }
  0xfe   :  { %v176_v45 = vadd.f32 1.0, %v541_v43 }
  0xff   :  { %546 = vrcp.f32 %v175_v44 }
 0x100   :  { %548 = vrcp.f32 %v176_v45 }
 0x105   :  { %v543_v46 = vpop.eup %542 }
 0x106   :  { %v545_v47 = vpop.eup %544  ;;  %v185_v50 = vmul.f32 %v543_v46, %v151_v26 }
 0x107   :  { %v186_v52 = vmul.f32 %v545_v47, %v153_v28  ;;  %v467_v47 = vpop.permute.xlu0 %466 }
 0x109   :  { %v547_v48 = vpop.eup %546 }
 0x10a   :  { %v549_v49 = vpop.eup %548  ;;  %v187_v51 = vmul.f32 %v547_v48, %v157_v33 }
 0x10b   :  { %v188_v53 = vmul.f32 %v549_v49, %v159_v35  ;;  %v462_v35 = vpop.permute.xlu1 %461 }
 0x10c   :  { %v522_v54 = vpack.c.bf16 %v187_v51, %v185_v50 }
 0x10d   :  { %v520_v55 = vpack.c.bf16 %v188_v53, %v186_v52 }
 0x10f   :  { %521 = vmatprep.subr.bf16.mxu1 %v520_v55  ;;  %525 = vmatprep.subr.bf16.mxu0 %v520_v55 }
 0x110   :  { %523 = vmatpush1.bf16.msra.mxu1 %v522_v54  ;;  %527 = vmatpush1.bf16.msra.mxu0 %v522_v54 }
 0x113   :  { %508 = vmatmul.mubr.msk.f32.vlgmr.msra.gmra.mrb[4].mxu1 %vm203_vm4, %v189_v56  ;;  %510 = vmatmul.mubr.msk.f32.vlgmr.msra.gmra.mrb[0].mxu0 %vm203_vm4, %v287_v57  ;;  %v472_v56 = vpop.permute.xlu1 %471 }
 0x114   :  { %280 = vmatprep.mubr.f32.mxu1 %v566_v6  ;;  %397 = vmatprep.mubr.f32.mxu0 %v566_v6 }
 0x117   :  { %509 = vmatmul.mubr.msk.f32.gmra.mrb[6].mxu1 %vm203_vm4, %v190_v58  ;;  %511 = vmatmul.mubr.msk.f32.gmra.mrb[2].mxu0 %vm203_vm4, %v288_v59 }
 0x118   :  { %403 = vmatprep.mubr.f32.mxu0 %v566_v6 }
 0x11b   :  { %512 = vmatmul.mubr.msk.f32.gmra.mrb[4].mxu0 %vm203_vm4, %v289_v60 }
 0x11c   :  { %409 = vmatprep.mubr.f32.mxu0 %v566_v6 }
 0x11f   :  { %513 = vmatmul.mubr.msk.f32.gmra.mrb[6].mxu0 %vm203_vm4, %v290_v61 }
 0x1e6   :  { %v276_v5 = vpop.f32.mrb[4].mxu1  ;;  %v393_v8 = vpop.f32.mrb[0].mxu0 }
 0x1e7   :  { %v277_v10 = vadd.f32 %v276_v5, %v196_v62  ;;  %v394_v6 = vadd.f32 %v393_v8, %v298_v0  ;;  %v278_v11 = vpop.f32.mrb[5].mxu1  ;;  %v395_v12 = vpop.f32.mrb[1].mxu0 }
 0x1e8   :  { %v279_v14 = vadd.f32 %v278_v11, %v196_v62  ;;  %v396_v15 = vadd.f32 %v395_v12, %v298_v0 }
 0x1e9   :  { %v419_v17 = vmul.f32 %v418_v7, %v277_v10  ;;  %v446_v18 = vmul.f32 %v445_v9, %v394_v6 }
 0x1ea   :  { %v420_v19 = vmul.f32 %v418_v7, %v279_v14  ;;  %v447_v20 = vmul.f32 %v445_v9, %v396_v15  ;;  %v282_v21 = vpop.f32.mrb[6].mxu1  ;;  %v399_v22 = vpop.f32.mrb[2].mxu0 }
 0x1eb   :  { %v433_v23 = vadd.f32 %v426_v4, %v419_v17  ;;  %v474_v24 = vadd.f32 %v457_v16, %v446_v18  ;;  %v283_v25 = vadd.f32 %v282_v21, %v201_v63  ;;  %v400_v26 = vadd.f32 %v399_v22, %v303_v1  ;;  %v284_v27 = vpop.f32.mrb[7].mxu1  ;;  %v401_v28 = vpop.f32.mrb[3].mxu0 }
 0x1ec   :  { %v434_v29 = vadd.f32 %v426_v4, %v420_v19  ;;  %v475_v30 = vadd.f32 %v457_v16, %v447_v20  ;;  %v285_v31 = vadd.f32 %v284_v27, %v201_v63  ;;  %v402_v32 = vadd.f32 %v401_v28, %v303_v1 }
 0x1ed   :  { %437 = vst [vmem:[%s763_s10] sm:$0xff] %v433_v23  ;;  %482 = vst [vmem:[%s764_s11] sm:$0xff] %v474_v24  ;;  %v421_v33 = vmul.f32 %v418_v7, %v283_v25  ;;  %v448_v34 = vmul.f32 %v445_v9, %v400_v26 }
 0x1ee   :  { %438 = vst [vmem:[%s763_s10 + $0x8] sm:$0xff] %v434_v29  ;;  %483 = vst [vmem:[%s764_s11 + $0x8] sm:$0xff] %v475_v30  ;;  %v422_v36 = vmul.f32 %v418_v7, %v285_v31  ;;  %v449_v37 = vmul.f32 %v445_v9, %v402_v32  ;;  %v405_v38 = vpop.f32.mrb[4].mxu0 }
 0x1ef   :  { %v435_v39 = vadd.f32 %v431_v13, %v421_v33  ;;  %v476_v40 = vadd.f32 %v462_v35, %v448_v34  ;;  %v406_v41 = vadd.f32 %v405_v38, %v308_v2  ;;  %v407_v42 = vpop.f32.mrb[5].mxu0 }
 0x1f0   :  { %v436_v43 = vadd.f32 %v431_v13, %v422_v36  ;;  %v477_v44 = vadd.f32 %v462_v35, %v449_v37  ;;  %v408_v45 = vadd.f32 %v407_v42, %v308_v2 }
 0x1f1   :  { %439 = vst [vmem:[%s763_s10 + $0x10] sm:$0x1] %v435_v39  ;;  %484 = vst [vmem:[%s764_s11 + $0x10] sm:$0xff] %v476_v40  ;;  %v450_v46 = vmul.f32 %v445_v9, %v406_v41 }
 0x1f2   :  { %440 = vst [vmem:[%s763_s10 + $0x18] sm:$0x1] %v436_v43  ;;  %485 = vst [vmem:[%s764_s11 + $0x18] sm:$0xff] %v477_v44  ;;  %v451_v48 = vmul.f32 %v445_v9, %v408_v45  ;;  %v411_v49 = vpop.f32.mrb[6].mxu0 }
 0x1f3   :  { %v478_v50 = vadd.f32 %v467_v47, %v450_v46  ;;  %v412_v51 = vadd.f32 %v411_v49, %v313_v3  ;;  %v413_v52 = vpop.f32.mrb[7].mxu0 }
 0x1f4   :  { %v479_v53 = vadd.f32 %v467_v47, %v451_v48  ;;  %v414_v54 = vadd.f32 %v413_v52, %v313_v3 }
 0x1f5   :  { %486 = vst [vmem:[%s764_s11 + $0x20] sm:$0xff] %v478_v50  ;;  %v452_v55 = vmul.f32 %v445_v9, %v412_v51 }
 0x1f6   :  { %487 = vst [vmem:[%s764_s11 + $0x28] sm:$0xff] %v479_v53  ;;  %v453_v57 = vmul.f32 %v445_v9, %v414_v54 }
 0x1f7   :  { %v480_v58 = vadd.f32 %v472_v56, %v452_v55 }
 0x1f8   :  { %v481_v59 = vadd.f32 %v472_v56, %v453_v57 }
 0x1f9   :  { %488 = vst [vmem:[%s764_s11 + $0x30] sm:$0xff] %v480_v58 }
 0x1fa   :  { %489 = vst [vmem:[%s764_s11 + $0x38] sm:$0xff] %v481_v59 }
 0x1fb   :  { %498 = vsyncpa [#allocation3], 1 }

</bundles_post_ra>
